<compile_context>
chip_gen: v6e
topology: v6e:2x2x1
jax: 0.10.0
libtpu: 0.0.40
codegen_flags: <defaults>
</compile_context>

<pallas_src>
import jax
import jax.numpy as jnp
from jax.experimental import pallas as pl
from jax.experimental.pallas import tpu as pltpu


def _round_up(x, m):
    return ((x + m - 1) // m) * m


def _choose_tm(M, tm):
    """Row tile: multiple of 8, <= tm, and >= 2 grid steps when M allows
    (keeps both v7x TensorCores busy via the 'parallel' grid axis)."""
    if M <= 8:
        return M                       # single tile == full dim, legal
    half = max(8, (M // 2) // 8 * 8)   # largest multiple of 8 <= M/2
    return min(tm, half)


def _vmem_budget_bytes():
    """~75% of physical VMEM: ~48 MiB on v7x (64 MiB/TC), ~96 MiB on v5e/v6e."""
    try:
        cap = int(pltpu.get_tpu_info().vmem_capacity_bytes)
    except Exception:
        cap = 64 * 1024 * 1024         # conservative fallback (v7x per-TC VMEM)
    return cap * 3 // 4


def prepare_ffn_params(w1, b1, w2, b2):
    """One-time (init-time) parameter prep, hoisted out of the per-call path:
    cast weights to bf16 for the MXU, keep biases in f32 as (1, N) rows."""
    return (jnp.asarray(w1, jnp.bfloat16),
            jnp.asarray(b1, jnp.float32).reshape(1, -1),
            jnp.asarray(w2, jnp.bfloat16),
            jnp.asarray(b2, jnp.float32).reshape(1, -1))


def ffn_kernel(x_ref, w1_ref, b1_ref, w2_ref, b2_ref, o_ref):
    # x_ref: (TM, E) caller dtype   w1_ref: (E, H) bf16   b1_ref: (1, H) f32
    # w2_ref: (H, E) bf16           b2_ref: (1, E) f32    o_ref: (TM, E) caller dtype
    x = x_ref[...].astype(w1_ref.dtype)                     # in-register bf16 cast
    h = jnp.dot(x, w1_ref[...], preferred_element_type=jnp.float32)
    h = jnp.maximum(h + b1_ref[...], 0.0)                   # bias + ReLU in f32
    o = jnp.dot(h.astype(w2_ref.dtype), w2_ref[...],
                preferred_element_type=jnp.float32)
    o = o + b2_ref[...]
    # Dropout(p=0.0) == identity.
    o_ref[...] = o.astype(o_ref.dtype)


def feed_forward(x, params, *, tm=512):
    """x: (B, T, E); params: output of prepare_ffn_params."""
    w1, b1, w2, b2 = params
    B, T, E = x.shape
    H = w1.shape[1]                    # 4 * E
    M = B * T

    TM = _choose_tm(M, tm)
    Mp = _round_up(M, TM)

    x2d = x.reshape(M, E)              # free reshape; no dtype / lane padding
    if Mp != M:
        # Only the M remainder (< TM rows) is padded; E / H stay unpadded.
        x2d = jnp.pad(x2d, ((0, Mp - M), (0, 0)))

    # TODO(synk): when the resident bf16 weights (~4*E*H bytes) approach the
    # VMEM budget (E >~ 1.5k on v7x), fall back to tiling H across a second
    # grid axis with an f32 accumulator instead of fully-resident weights.
    vmem_limit = _vmem_budget_bytes()

    resident = pl.Buffered(buffer_count=1)   # grid-invariant: fetch once, 1 buffer

    out2d = pl.pallas_call(
        ffn_kernel,
        out_shape=jax.ShapeDtypeStruct((Mp, E), x.dtype),
        grid_spec=pl.GridSpec(
            grid=(Mp // TM,),
            in_specs=[
                pl.BlockSpec((TM, E), lambda i: (i, 0)),     # x: streamed row tiles
                pl.BlockSpec((E, H), lambda i: (0, 0), pipeline_mode=resident),
                pl.BlockSpec((1, H), lambda i: (0, 0), pipeline_mode=resident),
                pl.BlockSpec((H, E), lambda i: (0, 0), pipeline_mode=resident),
                pl.BlockSpec((1, E), lambda i: (0, 0), pipeline_mode=resident),
            ],
            out_specs=pl.BlockSpec((TM, E), lambda i: (i, 0)),
        ),
        compiler_params=pltpu.CompilerParams(
            dimension_semantics=("parallel",),
            vmem_limit_bytes=vmem_limit,
        ),
    )(x2d, w1, b1, w2, b2)

    if Mp != M:
        out2d = out2d[:M]
    return out2d.reshape(B, T, E)


def reference(x, w1, b1, w2, b2):
    h = jnp.maximum(x @ w1 + b1, 0.0)
    return h @ w2 + b2


if __name__ == "__main__":
    # ModelConfig: n_embd = 32 -> hidden = 128. Small batch/seq for the demo.
    B, T, E = 2, 8, 32
    H = 4 * E

    key = jax.random.PRNGKey(0)
    kx, kw1, kb1, kw2, kb2 = jax.random.split(key, 5)

    x = jax.random.normal(kx, (B, T, E), dtype=jnp.float32)
    # std=0.02 weights as in _init_weights; small random biases to exercise
    # the bias-add path in the kernel.
    w1 = 0.02 * jax.random.normal(kw1, (E, H), dtype=jnp.float32)
    b1 = 0.02 * jax.random.normal(kb1, (H,), dtype=jnp.float32)
    w2 = 0.02 * jax.random.normal(kw2, (H, E), dtype=jnp.float32)
    b2 = 0.02 * jax.random.normal(kb2, (E,), dtype=jnp.float32)

    params = prepare_ffn_params(w1, b1, w2, b2)   # once, at "init" time
    out = feed_forward(x, params)
    jax.block_until_ready(out)

    ref = reference(x, w1, b1, w2, b2)
    assert out.shape == (B, T, E)
    assert out.dtype == x.dtype
    # bf16 MXU matmuls with f32 accumulation vs. full-f32 reference.
    assert jnp.allclose(out, ref, atol=1e-2, rtol=1e-2), float(
        jnp.max(jnp.abs(out - ref)))

    print("KERNEL_OK")
</pallas_src>

<mosaic_0001>
module attributes {stable_mosaic.version = 11 : i64} {
  func.func @ffn_kernel(%arg0: i32, %arg1: memref<8x32xf32, #tpu.memory_space<vmem>>, %arg2: memref<32x128xbf16, #tpu.memory_space<vmem>>, %arg3: memref<1x128xf32, #tpu.memory_space<vmem>>, %arg4: memref<128x32xbf16, #tpu.memory_space<vmem>>, %arg5: memref<1x32xf32, #tpu.memory_space<vmem>>, %arg6: memref<8x32xf32, #tpu.memory_space<vmem>>) attributes {dimension_semantics = [#tpu.dimension_semantics<parallel>], iteration_bounds = array<i64: 2>, scalar_prefetch = 0 : i64, scratch_operands = 0 : i64, tpu.core_type = #tpu.core_type<tc>, window_params = [{transform_indices = @transform_0, window_bounds = array<i64: 8, 32>}, {pipeline_mode = #tpu.pipeline_mode<synchronous>, transform_indices = @transform_1, window_bounds = array<i64: 32, 128>}, {pipeline_mode = #tpu.pipeline_mode<synchronous>, transform_indices = @transform_2, window_bounds = array<i64: 1, 128>}, {pipeline_mode = #tpu.pipeline_mode<synchronous>, transform_indices = @transform_3, window_bounds = array<i64: 128, 32>}, {pipeline_mode = #tpu.pipeline_mode<synchronous>, transform_indices = @transform_4, window_bounds = array<i64: 1, 32>}, {transform_indices = @transform_5, window_bounds = array<i64: 8, 32>}]} {
    %c0 = arith.constant 0 : index
    %c0_0 = arith.constant 0 : index
    %0 = vector.load %arg1[%c0, %c0_0] : memref<8x32xf32, #tpu.memory_space<vmem>>, vector<8x32xf32>
    %1 = arith.truncf %0 : vector<8x32xf32> to vector<8x32xbf16>
    %c0_1 = arith.constant 0 : index
    %c0_2 = arith.constant 0 : index
    %2 = vector.load %arg2[%c0_1, %c0_2] : memref<32x128xbf16, #tpu.memory_space<vmem>>, vector<32x128xbf16>
    %cst = arith.constant dense<0.000000e+00> : vector<8x128xf32>
    %3 = tpu.matmul %1, %2, %cst {dimension_numbers = #tpu.dot_dimension_numbers<[1], [0], [0], [1], [0, 0, 1, 1], [], []>} : vector<8x32xbf16>, vector<32x128xbf16>, vector<8x128xf32> -> vector<8x128xf32>
    %c0_3 = arith.constant 0 : index
    %c0_4 = arith.constant 0 : index
    %4 = vector.load %arg3[%c0_3, %c0_4] : memref<1x128xf32, #tpu.memory_space<vmem>>, vector<1x128xf32>
    %5 = vector.broadcast %4 : vector<1x128xf32> to vector<8x128xf32>
    %6 = arith.addf %3, %5 : vector<8x128xf32>
    %cst_5 = arith.constant 0.000000e+00 : f32
    %7 = vector.broadcast %cst_5 : f32 to vector<8x128xf32>
    %8 = arith.maximumf %6, %7 : vector<8x128xf32>
    %9 = arith.truncf %8 : vector<8x128xf32> to vector<8x128xbf16>
    %c0_6 = arith.constant 0 : index
    %c0_7 = arith.constant 0 : index
    %10 = vector.load %arg4[%c0_6, %c0_7] : memref<128x32xbf16, #tpu.memory_space<vmem>>, vector<128x32xbf16>
    %cst_8 = arith.constant dense<0.000000e+00> : vector<8x32xf32>
    %11 = tpu.matmul %9, %10, %cst_8 {dimension_numbers = #tpu.dot_dimension_numbers<[1], [0], [0], [1], [0, 0, 1, 1], [], []>} : vector<8x128xbf16>, vector<128x32xbf16>, vector<8x32xf32> -> vector<8x32xf32>
    %c0_9 = arith.constant 0 : index
    %c0_10 = arith.constant 0 : index
    %12 = vector.load %arg5[%c0_9, %c0_10] : memref<1x32xf32, #tpu.memory_space<vmem>>, vector<1x32xf32>
    %13 = vector.broadcast %12 : vector<1x32xf32> to vector<8x32xf32>
    %14 = arith.addf %11, %13 : vector<8x32xf32>
    %c0_11 = arith.constant 0 : index
    %c0_12 = arith.constant 0 : index
    %15 = vector.load %arg6[%c0_11, %c0_12] : memref<8x32xf32, #tpu.memory_space<vmem>>, vector<8x32xf32>
    tpu.vector_store %arg6[%c0_11, %c0_12], %14 {strides = array<i32>} : memref<8x32xf32, #tpu.memory_space<vmem>>, vector<8x32xf32>,
    return
  }
  func.func @transform_0(%arg0: i32) -> (i32, i32) {
    %c0_i32 = arith.constant 0 : i32
    %c0_i32_0 = arith.constant 0 : i32
    return %arg0, %c0_i32 : i32, i32
  }
  func.func @transform_1(%arg0: i32) -> (i32, i32) {
    %c0_i32 = arith.constant 0 : i32
    %c0_i32_0 = arith.constant 0 : i32
    %c0_i32_1 = arith.constant 0 : i32
    return %c0_i32, %c0_i32_0 : i32, i32
  }
  func.func @transform_2(%arg0: i32) -> (i32, i32) {
    %c0_i32 = arith.constant 0 : i32
    %c0_i32_0 = arith.constant 0 : i32
    %c0_i32_1 = arith.constant 0 : i32
    return %c0_i32, %c0_i32_0 : i32, i32
  }
  func.func @transform_3(%arg0: i32) -> (i32, i32) {
    %c0_i32 = arith.constant 0 : i32
    %c0_i32_0 = arith.constant 0 : i32
    %c0_i32_1 = arith.constant 0 : i32
    return %c0_i32, %c0_i32_0 : i32, i32
  }
  func.func @transform_4(%arg0: i32) -> (i32, i32) {
    %c0_i32 = arith.constant 0 : i32
    %c0_i32_0 = arith.constant 0 : i32
    %c0_i32_1 = arith.constant 0 : i32
    return %c0_i32, %c0_i32_0 : i32, i32
  }
  func.func @transform_5(%arg0: i32) -> (i32, i32) {
    %c0_i32 = arith.constant 0 : i32
    %c0_i32_0 = arith.constant 0 : i32
    return %arg0, %c0_i32 : i32, i32
  }
}

</mosaic_0001>

<bundles_post_ra>
// kernel: tpu_custom_call.1
= control target key start
LH: loop header
LB: loop body
LE: loop exit
PB: predicated region body
PF: predicated region fallthrough
CT: control target
= control target key end

     0   :  { %10 = vsyncpa [#allocation3], 0  ;;  %s823_s0 = inlined_call_operand.vmem [shape: f32[16,32], index: 0, kind: input, shape index: {}]   ;;  %s824_s1 = inlined_call_operand.vmem [shape: bf16[32,128], index: 1, kind: input, shape index: {}]   ;;  %s825_s2 = inlined_call_operand.vmem [shape: f32[1,128], index: 2, kind: input, shape index: {}]   ;;  %s826_s3 = inlined_call_operand.vmem [shape: bf16[128,32], index: 3, kind: input, shape index: {}]   ;;  %s827_s4 = inlined_call_operand.vmem [shape: f32[1,32], index: 4, kind: input, shape index: {}]   ;;  %s828_s5 = inlined_call_operand.hbm [shape: f32[16,32], index: 5, kind: output, shape index: {}]  }
   0x1   :  { %12 = vsyncpa [#allocation3 + $0x1], 0  ;;  %s686_s18 = smov 0   ;;  %s688_s19 = smov 0  }
   0x2   :  { %s690_s20 = smov 0   ;;  %s692_s21 = smov 0  }
   0x3 LB: > { %s707_s22 = sadd.s32 4294967295, %s651_s21   ;;  %s477_s23 = sadd.s32 4294967294, %s651_s21   ;;  %s651_s21 = sphi %s692_s21, %s834_s21   ;;  %s647_s20 = sphi %s690_s20, %s833_s20   ;;  %s643_s19 = sphi %s688_s19, %s832_s19   ;;  %s639_s18 = sphi %s686_s18, %s831_s18  }
   0x4   : > { %s711_s24 = sadd.s32 1, %s651_s21   ;;  %s135_s25 = sadd.s32 1, %s647_s20 }
   0x5   : > { %s132_s26 = ssub.s32 %s651_s21, %s711_s24  ;;  %p145_p0 = scmp.ne.s32.totalorder %s647_s20, %s643_s19 }
   0x6   : > { %p133_p1 = scmp.eq.s32.totalorder %s132_s26, 0  ;;  %p146_p2 = scmp.eq.s32.totalorder %s707_s22, 1 }
   0x7   : > { %p151_p3 = scmp.ne.s32.totalorder %s643_s19, %s639_s18  ;;  %p152_p4 = scmp.eq.s32.totalorder %s477_s23, 1 }
   0x8   : > { %s722_s27 = scalar_select %p133_p1, %s647_s20, %s135_s25  }
   0x9   : > { %p724_p5 = por %p146_p2, %p145_p0  ;;  %p728_p6 = por %p152_p4, %p151_p3 }
   0xa   : > { %p480_p7 = scmp.ge.s32.totalorder %s651_s21, 1  ;;  %p189_p8 = scmp.lt.s32.totalorder %s651_s21, 3 }
   0xc   : > { %p190_p9 = pnand %p480_p7, %p189_p8 }
   0xd   : > { %p216_p10 = scmp.lt.s32.totalorder (!%p190_p9), %s707_s22, 1  ;;  %s213_s16 = sand.u32 (!%p190_p9), 1, %s643_s19  }
   0xe   : > { %193 = sbr.rel (%p190_p9) target bundleno = 436 (0x1b4), region = 40  ;;  %s497_s26 = sshll.u32 (!%p190_p9), %s707_s22, 7 }
   0xf   : > { %s781_s9 = scalar_lea.hbm (!%p190_p9), %s828_s5, %s497_s26  ;;  %s405_s10 = scalar_lea.sflag (!%p190_p9), [#allocation3], %s213_s16 }
  0x13   : > { %v581_v0 = vld [vmem:[%s824_s1 + $0x8] sm:$0xff]   ;;  %v653_v1 = vmov 0.0   ;;  %v582_v2 = vld [vmem:[%s824_s1] sm:$0xff]   ;;  %vm654_vm0 = vmmov 0   ;;  %v583_v3 = vld [vmem:[%s826_s3 + $0x38] sm:$0xff]   ;;  %s217_s11 = scalar_select %p216_p10, %s707_s22, 1 }
  0x14   : > { %512 = vmatprep.subr.bf16.mxu0 %v653_v1  ;;  %520 = vmatprep.subr.bf16.mxu1 %v653_v1  ;;  %v584_v4 = vld [vmem:[%s826_s3 + $0x30] sm:$0xff]   ;;  %vm246_vm1 = vcmask 261120   ;;  %v585_v6 = vld [vmem:[%s826_s3 + $0x28] sm:$0xff]   ;;  %v586_v8 = vld [vmem:[%s826_s3 + $0x20] sm:$0xff]  }
  0x15   : > { %513 = vmatpush3.bf16.msra.mxu0 %v581_v0  ;;  %516 = vmatprep.mubr.msk.bf16.mxu0 %vm654_vm0, %v653_v1  ;;  %s482_s14 = sshll.u32 %s217_s11, 3  ;;  %v587_v9 = vld [vmem:[%s826_s3 + $0x18] sm:$0xff]   ;;  %v588_v10 = vld [vmem:[%s826_s3 + $0x10] sm:$0xff]   ;;  %v589_v11 = vld [vmem:[%s826_s3 + $0x8] sm:$0xff]   ;;  %s655_s11 = smov [#allocation2]  }
  0x16   : > { %514 = vmatprep.subr.bf16.mxu0 %v653_v1  ;;  %536 = vmatprep.mubr.msk.bf16.mxu1 %vm654_vm0, %v653_v1  ;;  %s219_s17 = scalar_lea.vmem %s823_s0, %s482_s14  ;;  %v590_v12 = vld [vmem:[%s826_s3] sm:$0xff]   ;;  %s595_s12 = sshll.u32 %s655_s11, 4  ;;  %s596_s12 = int_to_ptr.vmem [resolvable:$false] %s595_s12 }
  0x17   : > { %521 = vmatpush3.bf16.msra.mxu1 %v583_v3  ;;  %v221_v5 = vld [vmem:[%s219_s17] sm:$0xff]  ;;  %s481_s17 = sshll.u32 %s213_s16, 3  ;;  %s597_s13 = scalar_lea.vmem %s596_s12, 256 }
  0x18   : > { %522 = vmatprep.subr.bf16.mxu1 %v653_v1  ;;  %v222_v7 = vpack.c.bf16 %v221_v5, %v221_v5  ;;  %v483_v13 = vld [vmem:[%s825_s2] ss:$0 sm:$0xff]  ;;  %s215_s30 = scalar_lea.vmem [#allocation2], %s481_s17 }
  0x19   : > { %515 = vmatpush3.bf16.msra.mxu0 %v582_v2  ;;  %v487_v21 = vld [vmem:[%s827_s4] ss:$0 sm:$0xff]  ;;  %s418_s6 = sshll.u32 %s215_s30, 4  ;;  %s783_s6 = int_to_ptr.vmem [resolvable:$true] %s418_s6 }
  0x1a   : > { %s591_s22 = scalar_lea.vmem %s783_s6, 128  ;;  %p598_p0 = scmp.lt.s32.totalorder %s783_s6, %s596_s12 }
  0x1b   : > { %523 = vmatpush3.bf16.msra.mxu1 %v584_v4  ;;  %p592_p11 = scmp.ne.s32.totalorder %s783_s6, %s591_s22  ;;  %p599_p1 = scmp.lt.s32.totalorder %s597_s13, %s591_s22 }
  0x1c   : > { %524 = vmatprep.subr.bf16.mxu1 %v653_v1  ;;  %517 = vmatmul.mubr.msk.bf16.vlgmr.msra.gmra.mxu0 %vm246_vm1, %v222_v7 }
  0x1d   : > { %p593_p12 = pnand %p592_p11, %p724_p5  ;;  %p600_p2 = por %p599_p1, %p598_p0 }
  0x1f   : > { %525 = vmatpush3.bf16.msra.mxu1 %v585_v6  ;;  %p594_p13 = pneg %p593_p12 }
  0x20   : > { %526 = vmatprep.subr.bf16.mxu1 %v653_v1 }
  0x21   : > { %p601_p3 = pnand %p600_p2, %p594_p13 }
  0x23   : > { %527 = vmatpush3.bf16.msra.mxu1 %v586_v8 }
  0x24   : > { %528 = vmatprep.subr.bf16.mxu1 %v653_v1 }
  0x27   : > { %529 = vmatpush3.bf16.msra.mxu1 %v587_v9 }
  0x28   : > { %530 = vmatprep.subr.bf16.mxu1 %v653_v1 }
  0x2b   : > { %531 = vmatpush3.bf16.msra.mxu1 %v588_v10 }
  0x2c   : > { %532 = vmatprep.subr.bf16.mxu1 %v653_v1 }
  0x2f   : > { %533 = vmatpush3.bf16.msra.mxu1 %v589_v11 }
  0x30   : > { %534 = vmatprep.subr.bf16.mxu1 %v653_v1 }
  0x33   : > { %535 = vmatpush3.bf16.msra.mxu1 %v590_v12 }
  0xdc   : > { %v284_v14 = vpop.f32.mrf.mxu0 }
  0xdd   : > { %v285_v15 = vadd.f32 %v483_v13, %v284_v14 }
  0xde   : > { %v518_v16 = vpop.f32.mrf.mxu0 }
  0xdf   : > { %v290_v17 = vmax.f32 %v285_v15, 0.0 }
  0xe0   : > { %v287_v18 = vpop.f32.mrf.mxu0 }
  0xe1   : > { %v291_v19 = vpack.c.bf16 %v290_v17, %v290_v17 }
  0xe2   : > { %v519_v20 = vpop.f32.mrf.mxu0 }
  0xe3   : > { %537 = vmatmul.mubr.bf16.vlgmr.msra.gmra.mxu1 %v291_v19 }
 0x1a3   : > { %v397_v22 = vpop.f32.mrf.mxu1 }
 0x1a4   : > { %v398_v23 = vadd.f32 %v487_v21, %v397_v22 }
 0x1a5   : > { %v538_v24 = vpop.f32.mrf.mxu1 }
 0x1a6   : > { %403 = vst.msk [vmem:[%s215_s30] sm:$0xff] %vm246_vm1, %v398_v23 }
 0x1a7   : > { %v400_v25 = vpop.f32.mrf.mxu1 }
 0x1a8   : > { %604 = shalt.err (!%p601_p3)
}
 0x1a9   : > { %s605_s14 = scalar_lea.hbm %s781_s9, 128  ;;  %s609_s17 = scalar_lea.hbm %s828_s5, 256 }
 0x1aa   : > { %p606_p4 = scmp.ne.s32.totalorder %s781_s9, %s605_s14  ;;  %p610_p9 = scmp.lt.s32.totalorder %s781_s9, %s828_s5 }
 0x1ab   : > { %p611_p10 = scmp.lt.s32.totalorder %s609_s17, %s605_s14 }
 0x1ac   : > { %p607_p7 = pnand %p606_p4, %p724_p5 }
 0x1ad   : > { %p612_p11 = por %p611_p10, %p610_p9 }
 0x1ae   : > { %p608_p8 = pneg %p607_p7 }
 0x1b0   : > { %p613_p12 = pnand %p612_p11, %p608_p8 }
 0x1b2   : > { %616 = shalt.err (!%p613_p12)
}
 0x1b3   : > { %540 = dma.vmem_to_hbm [thread:$0]  (%p724_p5), %s783_s6, 128, %s781_s9, %s405_s10   ;;  %v539_v26 = vpop.f32.mrf.mxu1 }
 0x1b4 PF: > { %p546_p13 = scmp.ge.s32.totalorder %s651_s21, 2  ;;  %s430_s26 = sand.u32 1, %s639_s18  }
 0x1b5   : > { %s431_s30 = scalar_lea.sflag [#allocation3], %s430_s26 }
 0x1b6   : > { %p543_p0 = pnand %p546_p13, %p728_p6 }
 0x1b8   : > { %p544_p1 = pneg %p543_p0 }
 0x1ba   : > { %634 = dma.done.wait (%p544_p1), %s431_s30, 128  }
 0x1bb   : > { %636 = vsyncadd (%p544_p1), %s431_s30, 4294967168  ;;  %p15_p2 = scmp.ge.s32.totalorder %s711_s24, 4   ;;  %s831_s18 = smov %s643_s19 }
 0x1bc   : > { %s832_s19 = smov %s647_s20  ;;  %s833_s20 = smov %s722_s27 }
 0x1bd   : > { %s834_s21 = smov %s711_s24  ;;  %17 = sbr.rel (!%p15_p2) target bundleno = 3 (0x3), region = 75 }
 0x1c2   :  { %436 = vsyncpa [#allocation3], 1 }
 0x1c3   :  { %438 = vsyncpa [#allocation3 + $0x1], 1 }

</bundles_post_ra>
